<compile_context>
chip_gen: v7x
topology: tpu7x:2x2x1
jax: 0.10.0
libtpu: 0.0.40
codegen_flags: <defaults>
</compile_context>

<pallas_src>
import jax
import jax.numpy as jnp
import numpy as np
from jax.experimental import pallas as pl
from jax.experimental.pallas import tpu as pltpu


_SUBLANE = 8        # f32 sublane tile height
_LANE_WIDTH = 512   # lane-dense last dim (multiple of 128)


def _cdiv(a, b):
    return (a + b - 1) // b


def _reg_l2_kernel(scale_ref, w_ref, out_ref, acc_ref):
    """One grid step of the fused reg-penalty reduction.

    scale_ref : SMEM (1, 1) f32    -- val / n_total (folded scale)
    w_ref     : VMEM (G, 8, W)     -- current block of the zero-padded weight slab
    out_ref   : VMEM (1, 1) f32    -- final scalar: val * mean(weights**2)
    acc_ref   : VMEM (8, W) f32    -- running lane-dense partial sums (scratch)
    """
    step = pl.program_id(0)

    @pl.when(step == 0)
    def _init():
        acc_ref[...] = jnp.zeros_like(acc_ref)

    w = w_ref[...].astype(jnp.float32)
    # Reduce the leading (group) axis: a stack of pure-VPU vreg adds.
    acc_ref[...] += jnp.sum(w * w, axis=0)

    @pl.when(step == pl.num_programs(0) - 1)
    def _finalize():
        row = jnp.sum(acc_ref[...], axis=1, keepdims=True)    # (8, 1)  lane reduce (XLU)
        tot = jnp.sum(row, axis=0, keepdims=True)             # (1, 1)  sublane reduce
        out_ref[...] = tot * scale_ref[0, 0]                  # val * mean(w**2)


def reg_module_forward(weights, reg_val, *,
                       lane_width=_LANE_WIDTH,
                       target_tile_bytes=4 * 1024 * 1024):
    """val * mean(weights ** 2), fully fused into a single Pallas TPU kernel."""
    w = jnp.asarray(weights)
    n_total = int(np.prod(w.shape))
    assert n_total > 0, "weights must be non-empty"

    elem_bytes = jnp.dtype(w.dtype).itemsize
    row_elems = _SUBLANE * lane_width                       # elements per (8, W) group

    # Flatten (free for contiguous arrays) and view as whole (8, W) groups.
    n_groups = _cdiv(n_total, row_elems)
    groups_per_block = max(1, min(n_groups,
                                  target_tile_bytes // (row_elems * elem_bytes)))
    num_blocks = _cdiv(n_groups, groups_per_block)
    total_groups = num_blocks * groups_per_block

    flat = w.reshape(-1)
    pad = total_groups * row_elems - n_total
    if pad:
        # TODO(synk): for very large non-aligned weights this pad is one extra
        # HBM copy; a split main/tail path would avoid it.  Aligned sizes
        # (including the module's natural (prod(input_dims), num_units) when
        # divisible by 4096) take this zero-copy path.
        flat = jnp.pad(flat, (0, pad))
    slab = flat.reshape(total_groups, _SUBLANE, lane_width)

    tile_bytes = groups_per_block * row_elems * elem_bytes
    # double-buffered input + scratch/output, safe on every generation
    # (v7x has only 64 MiB VMEM per TensorCore).
    vmem_bytes = int(min(48 * 1024 * 1024, max(8 * 1024 * 1024, 3 * tile_bytes)))

    # Fold val and 1/n_total into a single scalar; no in-kernel divide.
    scale = (jnp.asarray(reg_val, jnp.float32) / jnp.float32(n_total)).reshape(1, 1)

    out = pl.pallas_call(
        _reg_l2_kernel,
        out_shape=jax.ShapeDtypeStruct((1, 1), jnp.float32),
        grid=(num_blocks,),
        in_specs=[
            pl.BlockSpec(memory_space=pltpu.MemorySpace.SMEM),               # scale
            pl.BlockSpec((groups_per_block, _SUBLANE, lane_width),
                         lambda i: (i, 0, 0)),                               # weights slab
        ],
        out_specs=pl.BlockSpec((1, 1), lambda i: (0, 0)),
        scratch_shapes=[pltpu.VMEM((_SUBLANE, lane_width), jnp.float32)],
        compiler_params=pltpu.CompilerParams(
            dimension_semantics=("arbitrary",),   # carried accumulator across blocks
            vmem_limit_bytes=vmem_bytes,
        ),
    )(scale, slab)

    return out[0, 0]


def reg_module_reference(weights, reg_val):
    """Pure-JAX reference of the forward pass."""
    rpen = weights.astype(jnp.float32) ** 2           # compute_reg_penalty (l2)
    rpen = jnp.float32(reg_val) * rpen                # self.val * rpen
    return rpen.mean()                                # rpen.mean()


if __name__ == "__main__":
    # Module config (synthetic, deterministic):
    #   input_dims = [4, 8, 8, 1] -> K = prod(input_dims) = 256
    #   num units  = 32           -> weights shape (256, 32)
    #   reg_val    = 0.01         -> registered buffer `val`
    input_dims = [4, 8, 8, 1]
    num_units = 32
    reg_val = 0.01

    K = int(np.prod(input_dims))
    key = jax.random.PRNGKey(0)
    k0, k1, k2 = jax.random.split(key, 3)

    # Main test: the module's natural (K, num_units) weight matrix (aligned path).
    weights = jax.random.normal(k0, (K, num_units), dtype=jnp.float32)
    out = jax.block_until_ready(reg_module_forward(weights, reg_val))
    ref = jax.block_until_ready(reg_module_reference(weights, reg_val))
    np.testing.assert_allclose(np.asarray(out), np.asarray(ref),
                               rtol=1e-5, atol=1e-6)

    # Odd, non-aligned shape: exercises the zero-padding path.
    weights_odd = jax.random.normal(k1, (97, 33), dtype=jnp.float32)
    out_odd = jax.block_until_ready(reg_module_forward(weights_odd, reg_val))
    ref_odd = jax.block_until_ready(reg_module_reference(weights_odd, reg_val))
    np.testing.assert_allclose(np.asarray(out_odd), np.asarray(ref_odd),
                               rtol=1e-5, atol=1e-6)

    # Small tiles forced: exercises the multi-step grid accumulate/finalize path.
    weights_grid = jax.random.normal(k2, (300, 47), dtype=jnp.float32)
    out_grid = jax.block_until_ready(
        reg_module_forward(weights_grid, reg_val, target_tile_bytes=16 * 1024))
    ref_grid = jax.block_until_ready(reg_module_reference(weights_grid, reg_val))
    np.testing.assert_allclose(np.asarray(out_grid), np.asarray(ref_grid),
                               rtol=1e-5, atol=1e-6)

    print("KERNEL_OK")
</pallas_src>

<mosaic_0001>
module attributes {stable_mosaic.version = 11 : i64} {
  func.func @_reg_l2_kernel(%arg0: i32, %arg1: memref<1x1xf32, #tpu.memory_space<smem>>, %arg2: memref<2x8x512xf32, #tpu.memory_space<vmem>>, %arg3: memref<1x1xf32, #tpu.memory_space<vmem>>, %arg4: memref<8x512xf32, #tpu.memory_space<vmem>>) attributes {dimension_semantics = [#tpu.dimension_semantics<arbitrary>], iteration_bounds = array<i64: 1>, scalar_prefetch = 0 : i64, scratch_operands = 1 : i64, tpu.core_type = #tpu.core_type<tc>, window_params = [{transform_indices = @transform_0, window_bounds = array<i64: 1, 1>}, {transform_indices = @transform_1, window_bounds = array<i64: 2, 8, 512>}, {pipeline_mode = #tpu.pipeline_mode<synchronous>, transform_indices = @transform_2, window_bounds = array<i64: 1, 1>}]} {
    %c0_i32 = arith.constant 0 : i32
    %0 = arith.cmpi eq, %arg0, %c0_i32 : i32
    %1 = arith.extui %0 : i1 to i32
    %c0_i32_0 = arith.constant 0 : i32
    %2 = arith.cmpi ne, %1, %c0_i32_0 : i32
    scf.if %2 {
      %cst_9 = arith.constant 0.000000e+00 : f32
      %12 = vector.broadcast %cst_9 : f32 to vector<8x512xf32>
      %c0_10 = arith.constant 0 : index
      %c0_11 = arith.constant 0 : index
      %13 = vector.load %arg4[%c0_10, %c0_11] : memref<8x512xf32, #tpu.memory_space<vmem>>, vector<8x512xf32>
      tpu.vector_store %arg4[%c0_10, %c0_11], %12 {strides = array<i32>} : memref<8x512xf32, #tpu.memory_space<vmem>>, vector<8x512xf32>,
    } else {
    }
    %c0 = arith.constant 0 : index
    %c0_1 = arith.constant 0 : index
    %c0_2 = arith.constant 0 : index
    %3 = vector.load %arg2[%c0, %c0_1, %c0_2] : memref<2x8x512xf32, #tpu.memory_space<vmem>>, vector<2x8x512xf32>
    %c0_3 = arith.constant 0 : index
    %c0_4 = arith.constant 0 : index
    %4 = vector.load %arg4[%c0_3, %c0_4] : memref<8x512xf32, #tpu.memory_space<vmem>>, vector<8x512xf32>
    %5 = arith.mulf %3, %3 : vector<2x8x512xf32>
    %cst = arith.constant dense<0.000000e+00> : vector<8x512xf32>
    %6 = vector.multi_reduction <add>, %5, %cst [0] : vector<2x8x512xf32> to vector<8x512xf32>
    %7 = arith.addf %4, %6 : vector<8x512xf32>
    %c0_5 = arith.constant 0 : index
    %c0_6 = arith.constant 0 : index
    %8 = vector.load %arg4[%c0_5, %c0_6] : memref<8x512xf32, #tpu.memory_space<vmem>>, vector<8x512xf32>
    tpu.vector_store %arg4[%c0_5, %c0_6], %7 {strides = array<i32>} : memref<8x512xf32, #tpu.memory_space<vmem>>, vector<8x512xf32>,
    %c0_i32_7 = arith.constant 0 : i32
    %9 = arith.cmpi eq, %arg0, %c0_i32_7 : i32
    %10 = arith.extui %9 : i1 to i32
    %c0_i32_8 = arith.constant 0 : i32
    %11 = arith.cmpi ne, %10, %c0_i32_8 : i32
    scf.if %11 {
      %c0_9 = arith.constant 0 : index
      %c0_10 = arith.constant 0 : index
      %12 = vector.load %arg4[%c0_9, %c0_10] : memref<8x512xf32, #tpu.memory_space<vmem>>, vector<8x512xf32>
      %cst_11 = arith.constant dense<0.000000e+00> : vector<8xf32>
      %13 = vector.multi_reduction <add>, %12, %cst_11 [1] : vector<8x512xf32> to vector<8xf32>
      %14 = vector.shape_cast %13 : vector<8xf32> to vector<8x1xf32>
      %cst_12 = arith.constant dense<0.000000e+00> : vector<1xf32>
      %15 = vector.multi_reduction <add>, %14, %cst_12 [0] : vector<8x1xf32> to vector<1xf32>
      %16 = vector.shape_cast %15 : vector<1xf32> to vector<1x1xf32>
      %c0_13 = arith.constant 0 : index
      %c0_14 = arith.constant 0 : index
      %17 = memref.load %arg1[%c0_13, %c0_14] : memref<1x1xf32, #tpu.memory_space<smem>>
      %18 = vector.broadcast %17 : f32 to vector<1x1xf32>
      %19 = arith.mulf %16, %18 : vector<1x1xf32>
      %c0_15 = arith.constant 0 : index
      %c0_16 = arith.constant 0 : index
      %20 = vector.load %arg3[%c0_15, %c0_16] : memref<1x1xf32, #tpu.memory_space<vmem>>, vector<1x1xf32>
      tpu.vector_store %arg3[%c0_15, %c0_16], %19 {strides = array<i32>} : memref<1x1xf32, #tpu.memory_space<vmem>>, vector<1x1xf32>,
    } else {
    }
    return
  }
  func.func @transform_0(%arg0: i32) -> (i32, i32) {
    %c0_i32 = arith.constant 0 : i32
    %c0_i32_0 = arith.constant 0 : i32
    %c0_i32_1 = arith.constant 0 : i32
    return %c0_i32, %c0_i32_0 : i32, i32
  }
  func.func @transform_1(%arg0: i32) -> (i32, i32, i32) {
    %c0_i32 = arith.constant 0 : i32
    %c0_i32_0 = arith.constant 0 : i32
    %c0_i32_1 = arith.constant 0 : i32
    return %arg0, %c0_i32, %c0_i32_0 : i32, i32, i32
  }
  func.func @transform_2(%arg0: i32) -> (i32, i32) {
    %c0_i32 = arith.constant 0 : i32
    %c0_i32_0 = arith.constant 0 : i32
    %c0_i32_1 = arith.constant 0 : i32
    return %c0_i32, %c0_i32_0 : i32, i32
  }
}

</mosaic_0001>

<bundles_post_ra>
// kernel: tpu_custom_call.1
= control target key start
LH: loop header
LB: loop body
LE: loop exit
PB: predicated region body
PF: predicated region fallthrough
CT: control target
= control target key end

     0   :  { %8 = vsyncpa [#allocation5], 0  ;;  %s203_s0 = inlined_call_operand.<no memory space> [shape: f32[1,1], index: 0, kind: input, shape index: {}]   ;;  %s204_s1 = inlined_call_operand.hbm [shape: f32[2,8,512], index: 1, kind: input, shape index: {}]   ;;  %s205_s2 = inlined_call_operand.hbm [shape: f32[1,1], index: 2, kind: output, shape index: {}]  }
   0x1   :  { %9 = vsyncpa [#allocation6], 0  ;;  %s157_s9 = smov [#allocation4]   ;;  %s109_s13 = scalar_lea.hbm %s204_s1, 1024 }
   0x2   :  { %s17_s10 = sshll.u32 %s157_s9, 4  ;;  %p110_p0 = scmp.ne.s32.totalorder %s204_s1, %s109_s13  ;;  %s18_s10 = int_to_ptr.vmem [resolvable:$true] %s17_s10 }
   0x3   :  { %p113_p1 = scmp.lt.u32.totalorder %s109_s13, %s204_s1 }
   0x5   :  { %p115_p2 = pnand %p113_p1, %p110_p0 }
   0x7   :  { %118 = shalt.err (!%p115_p2)
}
   0x8   :  { %s119_s18 = scalar_lea.vmem %s18_s10, 1024  ;;  %p124_p4 = scmp.lt.s32.totalorder %s18_s10, %s18_s10 }
   0x9   :  { %p120_p3 = scmp.ne.s32.totalorder %s18_s10, %s119_s18  ;;  %p125_p5 = scmp.lt.s32.totalorder %s119_s18, %s119_s18 }
   0xb   :  { %p126_p6 = por %p125_p5, %p124_p4 }
   0xd   :  { %p127_p7 = pnand %p126_p6, %p120_p3 }
   0xf   :  { %130 = shalt.err (!%p127_p7)
}
  0x10   :  { %s158_s19 = smov 512   ;;  %s159_s20 = smov 32  }
  0x11   :  { %23 = dma.hbm_to_vmem [thread:$0]  %s204_s1, 1024, %s18_s10, [#allocation5], %s158_s19, %s158_s19, %s159_s20  }
  0x12   :  { %153 = dma.done.wait [#allocation5], 1024  }
  0x13   :  { %154 = vsyncadd [#allocation5], 4294966272  ;;  %v35_v0 = vld [vmem:[#allocation4] sm:$0xff]  ;;  %v36_v1 = vld [vmem:[#allocation4 + $0x8] sm:$0xff]  ;;  %v86_v29 = vstv %s203_s0  ;;  %s160_s24 = smov [#allocation7]   ;;  %vm88_vm0 = vcmask 0  }
  0x14   :  { %v37_v2 = vld [vmem:[#allocation4 + $0x10] sm:$0xff]  ;;  %v38_v3 = vld [vmem:[#allocation4 + $0x18] sm:$0xff]  ;;  %v39_v4 = vld [vmem:[#allocation4 + $0x20] sm:$0xff]  ;;  %v47_v6 = vmul.f32 %v35_v0, %v35_v0  ;;  %v48_v7 = vmul.f32 %v36_v1, %v36_v1  ;;  %s96_s25 = sshll.u32 %s160_s24, 4  ;;  %s97_s25 = int_to_ptr.vmem [resolvable:$true] %s96_s25 }
  0x15   :  { %v40_v5 = vld [vmem:[#allocation4 + $0x28] sm:$0xff]  ;;  %v49_v8 = vmul.f32 %v37_v2, %v37_v2  ;;  %v41_v9 = vld [vmem:[#allocation4 + $0x30] sm:$0xff]  ;;  %v42_v10 = vld [vmem:[#allocation4 + $0x38] sm:$0xff]  ;;  %v50_v11 = vmul.f32 %v38_v3, %v38_v3  ;;  %v51_v12 = vmul.f32 %v39_v4, %v39_v4  ;;  %s131_s26 = scalar_lea.vmem %s97_s25, 16  ;;  %s135_s27 = scalar_lea.vmem %s97_s25, 32 }
  0x16   :  { %v52_v13 = vmul.f32 %v40_v5, %v40_v5  ;;  %v53_v14 = vmul.f32 %v41_v9, %v41_v9  ;;  %v54_v15 = vmul.f32 %v42_v10, %v42_v10  ;;  %p132_p8 = scmp.ne.s32.totalorder %s97_s25, %s131_s26  ;;  %p136_p9 = scmp.lt.s32.totalorder %s97_s25, %s97_s25 }
  0x17   :  { %v55_v16 = vadd.f32 %v51_v12, %v47_v6  ;;  %p137_p10 = scmp.lt.s32.totalorder %s135_s27, %s131_s26 }
  0x18   :  { %v56_v17 = vadd.f32 %v52_v13, %v48_v7  ;;  %v57_v18 = vadd.f32 %v53_v14, %v49_v8  ;;  %v58_v19 = vadd.f32 %v54_v15, %v50_v11 }
  0x19   :  { %p138_p11 = por %p137_p10, %p136_p9 }
  0x1a   :  { %v74_v20 = vadd.f32 %v56_v17, %v55_v16 }
  0x1b   :  { %p139_p12 = pnand %p138_p11, %p132_p8 }
  0x1c   :  { %v75_v21 = vadd.f32 %v74_v20, %v57_v18 }
  0x1e   :  { %v76_v22 = vadd.f32 %v75_v21, %v58_v19 }
  0x20   :  { %77 = vadd.xlane.f32.xlu0 %v76_v22 }
  0xad   :  { %v78_v23 = vpop.xlane.xlu0 %77 }
  0xae   :  { %v79_v24 = vrot.slane %v78_v23, 4 }
  0xb0   :  { %v80_v25 = vadd.f32 %v79_v24, %v78_v23 }
  0xb2   :  { %v81_v26 = vrot.slane %v80_v25, 2 }
  0xb4   :  { %v82_v27 = vadd.f32 %v81_v26, %v80_v25 }
  0xb6   :  { %v83_v28 = vrot.slane %v82_v27, 1 }
  0xb8   :  { %v84_v30 = vadd.f32 %v83_v28, %v82_v27 }
  0xba   :  { %v87_v31 = vmul.f32 %v86_v29, %v84_v30 }
  0xbc   :  { %89 = vst.msk [vmem:[#allocation7] sm:$0x1] %vm88_vm0, %v87_v31 }
  0xbd   :  { %142 = shalt.err (!%p139_p12)
}
  0xbe   :  { %s143_s30 = scalar_lea.hbm %s205_s2, 16 }
  0xbf   :  { %p144_p13 = scmp.ne.s32.totalorder %s205_s2, %s143_s30  ;;  %p147_p0 = scmp.lt.u32.totalorder %s143_s30, %s205_s2 }
  0xc1   :  { %p149_p1 = pnand %p147_p0, %p144_p13 }
  0xc3   :  { %152 = shalt.err (!%p149_p1)
}
  0xc4   :  { %99 = dma.vmem_to_hbm [thread:$0]  %s97_s25, 16, %s205_s2, [#allocation6]  }
  0xc5   :  { %155 = dma.done.wait [#allocation6], 16  }
  0xc6   :  { %156 = vsyncadd [#allocation6], 4294967280 }
  0xc7   :  { %103 = vsyncpa [#allocation5], 1 }
  0xc8   :  { %104 = vsyncpa [#allocation6], 1 }

</bundles_post_ra>
